<compile_context>
chip_gen: v5e
topology: v5e:2x2
jax: 0.10.0
libtpu: 0.0.40
codegen_flags: <defaults>
</compile_context>

<pallas_src>
import jax
import jax.numpy as jnp
from jax.experimental import pallas as pl
from jax.experimental.pallas import tpu as pltpu

LANE = 128
SUBLANE = 8


def _round_up(v, m):
    return ((v + m - 1) // m) * m


def _pick_tile(batch, tile_b):
    """Pick a batch tile (multiple of 8) that avoids padding x when possible and
    gives >= 2 grid steps for large batches (v7x has 2 TensorCores per chip)."""
    b8 = _round_up(max(batch, 1), SUBLANE)
    t = max(SUBLANE, min(_round_up(tile_b, SUBLANE), b8))
    if b8 % t != 0:
        # search (down to half the requested tile) for a divisor of b8 so the
        # wrapper never has to materialize a padded copy of x
        cand = t
        floor = max(SUBLANE, t // 2)
        while cand > floor and b8 % cand != 0:
            cand -= SUBLANE
        if cand >= SUBLANE and b8 % cand == 0:
            t = cand
    # moderate/large batches: ensure at least 2 grid steps so v7x's 2nd TC has work
    if batch >= 1024 and b8 <= t:
        t = max(SUBLANE, _round_up(b8 // 2, SUBLANE))
    b_pad = _round_up(b8, t)
    return t, b_pad


def mlp_kernel(x_ref,
               w1_ref, b1_ref,
               w2_ref, b2_ref,
               w3_ref, b3_ref,
               w4_ref, b4_ref,
               w5_ref, b5_ref,
               w6_ref, b6_ref,
               o_ref):
    """Whole forward pass fused for one batch tile (weights stay VMEM-resident)."""

    def dense(h, w_ref, b_ref, relu=True):
        # operands may be bf16 (native MXU path); accumulation stays f32
        y = jnp.dot(h.astype(w_ref.dtype), w_ref[...],
                    preferred_element_type=jnp.float32) + b_ref[...]
        return jnp.maximum(y, 0.0) if relu else y

    h = x_ref[...]                          # [T, n_feature]  (narrow, unpadded)
    h = dense(h, w1_ref, b1_ref)            # [T, 128]  (64 padded to 128 lanes)
    h = dense(h, w2_ref, b2_ref)            # [T, 128]
    h = dense(h, w3_ref, b3_ref)            # [T, 128]  (64 padded)
    h = dense(h, w4_ref, b4_ref)            # [T, 128]  (32 padded)
    h = dense(h, w5_ref, b5_ref)            # [T, 128]  (8 padded)
    o_ref[...] = dense(h, w6_ref, b6_ref, relu=False)   # [T, n_output]  (narrow)


def net_forward(x, params, *, tile_b=1024, use_bf16=False):
    """x: [batch, n_feature] f32; params: list of (W [in,out], b [1,out])."""
    B, n_feature = x.shape
    n_output = params[-1][0].shape[1]

    # ---- pad only the HIDDEN feature dims to 128 lanes (exact: zero padding) ----
    dims = [n_feature] + [w.shape[1] for (w, _) in params]          # [32,64,128,64,32,8,nout]
    pdims = [dims[0]] + [_round_up(d, LANE) for d in dims[1:-1]] + [dims[-1]]

    w_dtype = jnp.bfloat16 if use_bf16 else jnp.float32
    padded = []
    for i, (w, b) in enumerate(params):
        wp = (jnp.zeros((pdims[i], pdims[i + 1]), w_dtype)
              .at[: w.shape[0], : w.shape[1]].set(w.astype(w_dtype)))
        bp = (jnp.zeros((1, pdims[i + 1]), jnp.float32)
              .at[:, : b.shape[1]].set(b))
        padded.append((wp, bp))

    # ---- batch tiling (no padded x copy unless strictly required) ----
    tile_b, b_pad = _pick_tile(B, tile_b)
    x_p = x if b_pad == B else jnp.pad(x, ((0, b_pad - B), (0, 0)))

    flat_args = [x_p]
    in_specs = [pl.BlockSpec((tile_b, pdims[0]), lambda i: (i, 0))]
    for (wp, bp) in padded:
        flat_args += [wp, bp]
        # full-array blocks with constant index_map -> VMEM-resident across steps
        in_specs += [pl.BlockSpec(wp.shape, lambda i: (0, 0)),
                     pl.BlockSpec(bp.shape, lambda i: (0, 0))]

    out_spec = pl.BlockSpec((tile_b, pdims[-1]), lambda i: (i, 0))

    # ---- VMEM budget: weights (double-buffered inputs) + 2x(x/out tiles) + acts ----
    f32b = 4
    wdt = 2 if use_bf16 else 4
    w_bytes = 2 * sum(int(w.size) * wdt + int(b.size) * f32b for w, b in padded)
    io_bytes = 2 * tile_b * (pdims[0] + pdims[-1]) * f32b          # double-buffered x/out
    act_bytes = 4 * tile_b * max(pdims) * f32b                      # live activation temps
    vmem_limit = int(min(max(w_bytes + io_bytes + act_bytes + (8 << 20), 32 << 20),
                         48 << 20))                                 # safe under v7x 64 MiB

    out_p = pl.pallas_call(
        mlp_kernel,
        out_shape=jax.ShapeDtypeStruct((b_pad, pdims[-1]), jnp.float32),
        grid=(b_pad // tile_b,),
        in_specs=in_specs,
        out_specs=out_spec,
        compiler_params=pltpu.CompilerParams(
            dimension_semantics=("parallel",),
            vmem_limit_bytes=vmem_limit,
        ),
    )(*flat_args)

    # output lanes are already exactly n_output wide; only strip batch padding
    return out_p if b_pad == B else out_p[:B]


def init_params(key, n_feature, n_output):
    """Deterministic init matching the PyTorch module's layer shapes."""
    dims = [n_feature, 64, 128, 64, 32, 8, n_output]
    params = []
    for i in range(len(dims) - 1):
        fan_in, fan_out = dims[i], dims[i + 1]
        key, kw, kb = jax.random.split(key, 3)
        bound = 1.0 / jnp.sqrt(fan_in)
        # stored as [in, out] (transposed relative to torch's [out, in])
        w = jax.random.uniform(kw, (fan_in, fan_out), jnp.float32, -bound, bound)
        b = jax.random.uniform(kb, (1, fan_out), jnp.float32, -bound, bound)
        params.append((w, b))
    return params


def reference_forward(x, params):
    h = x
    for i, (w, b) in enumerate(params):
        h = h @ w + b
        if i < len(params) - 1:
            h = jnp.maximum(h, 0.0)
    return h


if __name__ == "__main__":
    n_feature = 32
    n_output = 4
    batch = 16

    key = jax.random.PRNGKey(0)
    key, kx = jax.random.split(key)
    x = jax.random.normal(kx, (batch, n_feature), jnp.float32)

    params = init_params(key, n_feature, n_output)

    out = net_forward(x, params)            # f32 path: bit-faithful to the module
    out = jax.block_until_ready(out)

    ref = reference_forward(x, params)
    assert out.shape == (batch, n_output)
    assert jnp.allclose(out, ref, atol=1e-5, rtol=1e-5), "mismatch vs JAX reference"

    print("KERNEL_OK")
</pallas_src>

<mosaic_0001>
module attributes {stable_mosaic.version = 11 : i64} {
  func.func @mlp_kernel(%arg0: i32, %arg1: memref<16x32xf32, #tpu.memory_space<vmem>>, %arg2: memref<32x128xf32, #tpu.memory_space<vmem>>, %arg3: memref<1x128xf32, #tpu.memory_space<vmem>>, %arg4: memref<128x128xf32, #tpu.memory_space<vmem>>, %arg5: memref<1x128xf32, #tpu.memory_space<vmem>>, %arg6: memref<128x128xf32, #tpu.memory_space<vmem>>, %arg7: memref<1x128xf32, #tpu.memory_space<vmem>>, %arg8: memref<128x128xf32, #tpu.memory_space<vmem>>, %arg9: memref<1x128xf32, #tpu.memory_space<vmem>>, %arg10: memref<128x128xf32, #tpu.memory_space<vmem>>, %arg11: memref<1x128xf32, #tpu.memory_space<vmem>>, %arg12: memref<128x4xf32, #tpu.memory_space<vmem>>, %arg13: memref<1x4xf32, #tpu.memory_space<vmem>>, %arg14: memref<16x4xf32, #tpu.memory_space<vmem>>) attributes {dimension_semantics = [#tpu.dimension_semantics<parallel>], iteration_bounds = array<i64: 1>, scalar_prefetch = 0 : i64, scratch_operands = 0 : i64, tpu.core_type = #tpu.core_type<tc>, window_params = [{transform_indices = @transform_0, window_bounds = array<i64: 16, 32>}, {pipeline_mode = #tpu.pipeline_mode<synchronous>, transform_indices = @transform_1, window_bounds = array<i64: 32, 128>}, {pipeline_mode = #tpu.pipeline_mode<synchronous>, transform_indices = @transform_2, window_bounds = array<i64: 1, 128>}, {pipeline_mode = #tpu.pipeline_mode<synchronous>, transform_indices = @transform_3, window_bounds = array<i64: 128, 128>}, {pipeline_mode = #tpu.pipeline_mode<synchronous>, transform_indices = @transform_4, window_bounds = array<i64: 1, 128>}, {pipeline_mode = #tpu.pipeline_mode<synchronous>, transform_indices = @transform_5, window_bounds = array<i64: 128, 128>}, {pipeline_mode = #tpu.pipeline_mode<synchronous>, transform_indices = @transform_6, window_bounds = array<i64: 1, 128>}, {pipeline_mode = #tpu.pipeline_mode<synchronous>, transform_indices = @transform_7, window_bounds = array<i64: 128, 128>}, {pipeline_mode = #tpu.pipeline_mode<synchronous>, transform_indices = @transform_8, window_bounds = array<i64: 1, 128>}, {pipeline_mode = #tpu.pipeline_mode<synchronous>, transform_indices = @transform_9, window_bounds = array<i64: 128, 128>}, {pipeline_mode = #tpu.pipeline_mode<synchronous>, transform_indices = @transform_10, window_bounds = array<i64: 1, 128>}, {pipeline_mode = #tpu.pipeline_mode<synchronous>, transform_indices = @transform_11, window_bounds = array<i64: 128, 4>}, {pipeline_mode = #tpu.pipeline_mode<synchronous>, transform_indices = @transform_12, window_bounds = array<i64: 1, 4>}, {transform_indices = @transform_13, window_bounds = array<i64: 16, 4>}]} {
    %c0 = arith.constant 0 : index
    %c0_0 = arith.constant 0 : index
    %0 = vector.load %arg1[%c0, %c0_0] : memref<16x32xf32, #tpu.memory_space<vmem>>, vector<16x32xf32>
    %c0_1 = arith.constant 0 : index
    %c0_2 = arith.constant 0 : index
    %1 = vector.load %arg2[%c0_1, %c0_2] : memref<32x128xf32, #tpu.memory_space<vmem>>, vector<32x128xf32>
    %cst = arith.constant dense<0.000000e+00> : vector<16x128xf32>
    %2 = tpu.matmul %0, %1, %cst {dimension_numbers = #tpu.dot_dimension_numbers<[1], [0], [0], [1], [0, 0, 1, 1], [], []>} : vector<16x32xf32>, vector<32x128xf32>, vector<16x128xf32> -> vector<16x128xf32>
    %c0_3 = arith.constant 0 : index
    %c0_4 = arith.constant 0 : index
    %3 = vector.load %arg3[%c0_3, %c0_4] : memref<1x128xf32, #tpu.memory_space<vmem>>, vector<1x128xf32>
    %4 = vector.broadcast %3 : vector<1x128xf32> to vector<16x128xf32>
    %5 = arith.addf %2, %4 : vector<16x128xf32>
    %cst_5 = arith.constant 0.000000e+00 : f32
    %6 = vector.broadcast %cst_5 : f32 to vector<16x128xf32>
    %7 = arith.maximumf %5, %6 : vector<16x128xf32>
    %c0_6 = arith.constant 0 : index
    %c0_7 = arith.constant 0 : index
    %8 = vector.load %arg4[%c0_6, %c0_7] : memref<128x128xf32, #tpu.memory_space<vmem>>, vector<128x128xf32>
    %cst_8 = arith.constant dense<0.000000e+00> : vector<16x128xf32>
    %9 = tpu.matmul %7, %8, %cst_8 {dimension_numbers = #tpu.dot_dimension_numbers<[1], [0], [0], [1], [0, 0, 1, 1], [], []>} : vector<16x128xf32>, vector<128x128xf32>, vector<16x128xf32> -> vector<16x128xf32>
    %c0_9 = arith.constant 0 : index
    %c0_10 = arith.constant 0 : index
    %10 = vector.load %arg5[%c0_9, %c0_10] : memref<1x128xf32, #tpu.memory_space<vmem>>, vector<1x128xf32>
    %11 = vector.broadcast %10 : vector<1x128xf32> to vector<16x128xf32>
    %12 = arith.addf %9, %11 : vector<16x128xf32>
    %cst_11 = arith.constant 0.000000e+00 : f32
    %13 = vector.broadcast %cst_11 : f32 to vector<16x128xf32>
    %14 = arith.maximumf %12, %13 : vector<16x128xf32>
    %c0_12 = arith.constant 0 : index
    %c0_13 = arith.constant 0 : index
    %15 = vector.load %arg6[%c0_12, %c0_13] : memref<128x128xf32, #tpu.memory_space<vmem>>, vector<128x128xf32>
    %cst_14 = arith.constant dense<0.000000e+00> : vector<16x128xf32>
    %16 = tpu.matmul %14, %15, %cst_14 {dimension_numbers = #tpu.dot_dimension_numbers<[1], [0], [0], [1], [0, 0, 1, 1], [], []>} : vector<16x128xf32>, vector<128x128xf32>, vector<16x128xf32> -> vector<16x128xf32>
    %c0_15 = arith.constant 0 : index
    %c0_16 = arith.constant 0 : index
    %17 = vector.load %arg7[%c0_15, %c0_16] : memref<1x128xf32, #tpu.memory_space<vmem>>, vector<1x128xf32>
    %18 = vector.broadcast %17 : vector<1x128xf32> to vector<16x128xf32>
    %19 = arith.addf %16, %18 : vector<16x128xf32>
    %cst_17 = arith.constant 0.000000e+00 : f32
    %20 = vector.broadcast %cst_17 : f32 to vector<16x128xf32>
    %21 = arith.maximumf %19, %20 : vector<16x128xf32>
    %c0_18 = arith.constant 0 : index
    %c0_19 = arith.constant 0 : index
    %22 = vector.load %arg8[%c0_18, %c0_19] : memref<128x128xf32, #tpu.memory_space<vmem>>, vector<128x128xf32>
    %cst_20 = arith.constant dense<0.000000e+00> : vector<16x128xf32>
    %23 = tpu.matmul %21, %22, %cst_20 {dimension_numbers = #tpu.dot_dimension_numbers<[1], [0], [0], [1], [0, 0, 1, 1], [], []>} : vector<16x128xf32>, vector<128x128xf32>, vector<16x128xf32> -> vector<16x128xf32>
    %c0_21 = arith.constant 0 : index
    %c0_22 = arith.constant 0 : index
    %24 = vector.load %arg9[%c0_21, %c0_22] : memref<1x128xf32, #tpu.memory_space<vmem>>, vector<1x128xf32>
    %25 = vector.broadcast %24 : vector<1x128xf32> to vector<16x128xf32>
    %26 = arith.addf %23, %25 : vector<16x128xf32>
    %cst_23 = arith.constant 0.000000e+00 : f32
    %27 = vector.broadcast %cst_23 : f32 to vector<16x128xf32>
    %28 = arith.maximumf %26, %27 : vector<16x128xf32>
    %c0_24 = arith.constant 0 : index
    %c0_25 = arith.constant 0 : index
    %29 = vector.load %arg10[%c0_24, %c0_25] : memref<128x128xf32, #tpu.memory_space<vmem>>, vector<128x128xf32>
    %cst_26 = arith.constant dense<0.000000e+00> : vector<16x128xf32>
    %30 = tpu.matmul %28, %29, %cst_26 {dimension_numbers = #tpu.dot_dimension_numbers<[1], [0], [0], [1], [0, 0, 1, 1], [], []>} : vector<16x128xf32>, vector<128x128xf32>, vector<16x128xf32> -> vector<16x128xf32>
    %c0_27 = arith.constant 0 : index
    %c0_28 = arith.constant 0 : index
    %31 = vector.load %arg11[%c0_27, %c0_28] : memref<1x128xf32, #tpu.memory_space<vmem>>, vector<1x128xf32>
    %32 = vector.broadcast %31 : vector<1x128xf32> to vector<16x128xf32>
    %33 = arith.addf %30, %32 : vector<16x128xf32>
    %cst_29 = arith.constant 0.000000e+00 : f32
    %34 = vector.broadcast %cst_29 : f32 to vector<16x128xf32>
    %35 = arith.maximumf %33, %34 : vector<16x128xf32>
    %c0_30 = arith.constant 0 : index
    %c0_31 = arith.constant 0 : index
    %36 = vector.load %arg12[%c0_30, %c0_31] : memref<128x4xf32, #tpu.memory_space<vmem>>, vector<128x4xf32>
    %cst_32 = arith.constant dense<0.000000e+00> : vector<16x4xf32>
    %37 = tpu.matmul %35, %36, %cst_32 {dimension_numbers = #tpu.dot_dimension_numbers<[1], [0], [0], [1], [0, 0, 1, 1], [], []>} : vector<16x128xf32>, vector<128x4xf32>, vector<16x4xf32> -> vector<16x4xf32>
    %c0_33 = arith.constant 0 : index
    %c0_34 = arith.constant 0 : index
    %38 = vector.load %arg13[%c0_33, %c0_34] : memref<1x4xf32, #tpu.memory_space<vmem>>, vector<1x4xf32>
    %39 = vector.broadcast %38 : vector<1x4xf32> to vector<16x4xf32>
    %40 = arith.addf %37, %39 : vector<16x4xf32>
    %c0_35 = arith.constant 0 : index
    %c0_36 = arith.constant 0 : index
    %41 = vector.load %arg14[%c0_35, %c0_36] : memref<16x4xf32, #tpu.memory_space<vmem>>, vector<16x4xf32>
    tpu.vector_store %arg14[%c0_35, %c0_36], %40 {strides = array<i32>} : memref<16x4xf32, #tpu.memory_space<vmem>>, vector<16x4xf32>,
    return
  }
  func.func @transform_0(%arg0: i32) -> (i32, i32) {
    %c0_i32 = arith.constant 0 : i32
    %c0_i32_0 = arith.constant 0 : i32
    return %arg0, %c0_i32 : i32, i32
  }
  func.func @transform_1(%arg0: i32) -> (i32, i32) {
    %c0_i32 = arith.constant 0 : i32
    %c0_i32_0 = arith.constant 0 : i32
    %c0_i32_1 = arith.constant 0 : i32
    return %c0_i32, %c0_i32_0 : i32, i32
  }
  func.func @transform_2(%arg0: i32) -> (i32, i32) {
    %c0_i32 = arith.constant 0 : i32
    %c0_i32_0 = arith.constant 0 : i32
    %c0_i32_1 = arith.constant 0 : i32
    return %c0_i32, %c0_i32_0 : i32, i32
  }
  func.func @transform_3(%arg0: i32) -> (i32, i32) {
    %c0_i32 = arith.constant 0 : i32
    %c0_i32_0 = arith.constant 0 : i32
    %c0_i32_1 = arith.constant 0 : i32
    return %c0_i32, %c0_i32_0 : i32, i32
  }
  func.func @transform_4(%arg0: i32) -> (i32, i32) {
    %c0_i32 = arith.constant 0 : i32
    %c0_i32_0 = arith.constant 0 : i32
    %c0_i32_1 = arith.constant 0 : i32
    return %c0_i32, %c0_i32_0 : i32, i32
  }
  func.func @transform_5(%arg0: i32) -> (i32, i32) {
    %c0_i32 = arith.constant 0 : i32
    %c0_i32_0 = arith.constant 0 : i32
    %c0_i32_1 = arith.constant 0 : i32
    return %c0_i32, %c0_i32_0 : i32, i32
  }
  func.func @transform_6(%arg0: i32) -> (i32, i32) {
    %c0_i32 = arith.constant 0 : i32
    %c0_i32_0 = arith.constant 0 : i32
    %c0_i32_1 = arith.constant 0 : i32
    return %c0_i32, %c0_i32_0 : i32, i32
  }
  func.func @transform_7(%arg0: i32) -> (i32, i32) {
    %c0_i32 = arith.constant 0 : i32
    %c0_i32_0 = arith.constant 0 : i32
    %c0_i32_1 = arith.constant 0 : i32
    return %c0_i32, %c0_i32_0 : i32, i32
  }
  func.func @transform_8(%arg0: i32) -> (i32, i32) {
    %c0_i32 = arith.constant 0 : i32
    %c0_i32_0 = arith.constant 0 : i32
    %c0_i32_1 = arith.constant 0 : i32
    return %c0_i32, %c0_i32_0 : i32, i32
  }
  func.func @transform_9(%arg0: i32) -> (i32, i32) {
    %c0_i32 = arith.constant 0 : i32
    %c0_i32_0 = arith.constant 0 : i32
    %c0_i32_1 = arith.constant 0 : i32
    return %c0_i32, %c0_i32_0 : i32, i32
  }
  func.func @transform_10(%arg0: i32) -> (i32, i32) {
    %c0_i32 = arith.constant 0 : i32
    %c0_i32_0 = arith.constant 0 : i32
    %c0_i32_1 = arith.constant 0 : i32
    return %c0_i32, %c0_i32_0 : i32, i32
  }
  func.func @transform_11(%arg0: i32) -> (i32, i32) {
    %c0_i32 = arith.constant 0 : i32
    %c0_i32_0 = arith.constant 0 : i32
    %c0_i32_1 = arith.constant 0 : i32
    return %c0_i32, %c0_i32_0 : i32, i32
  }
  func.func @transform_12(%arg0: i32) -> (i32, i32) {
    %c0_i32 = arith.constant 0 : i32
    %c0_i32_0 = arith.constant 0 : i32
    %c0_i32_1 = arith.constant 0 : i32
    return %c0_i32, %c0_i32_0 : i32, i32
  }
  func.func @transform_13(%arg0: i32) -> (i32, i32) {
    %c0_i32 = arith.constant 0 : i32
    %c0_i32_0 = arith.constant 0 : i32
    return %arg0, %c0_i32 : i32, i32
  }
}

</mosaic_0001>

<bundles_post_ra>
// kernel: tpu_custom_call.1
= control target key start
LH: loop header
LB: loop body
LE: loop exit
PB: predicated region body
PF: predicated region fallthrough
CT: control target
= control target key end

     0   :  { %18 = vsyncpa [#allocation3], 0  ;;  %s766_s0 = inlined_call_operand.hbm [shape: f32[16,32], index: 0, kind: input, shape index: {}]   ;;  %s767_s1 = inlined_call_operand.hbm [shape: f32[32,128], index: 1, kind: input, shape index: {}]   ;;  %s768_s2 = inlined_call_operand.vmem [shape: f32[1,128], index: 2, kind: input, shape index: {}]   ;;  %s769_s3 = inlined_call_operand.vmem [shape: f32[128,128], index: 3, kind: input, shape index: {}]   ;;  %s770_s4 = inlined_call_operand.vmem [shape: f32[1,128], index: 4, kind: input, shape index: {}]   ;;  %s771_s5 = inlined_call_operand.hbm [shape: f32[128,128], index: 5, kind: input, shape index: {}]   ;;  %s772_s6 = inlined_call_operand.vmem [shape: f32[1,128], index: 6, kind: input, shape index: {}]   ;;  %s773_s7 = inlined_call_operand.hbm [shape: f32[128,128], index: 7, kind: input, shape index: {}]   ;;  %s774_s8 = inlined_call_operand.vmem [shape: f32[1,128], index: 8, kind: input, shape index: {}]   ;;  %s775_s9 = inlined_call_operand.hbm [shape: f32[128,128], index: 9, kind: input, shape index: {}]   ;;  %s776_s10 = inlined_call_operand.vmem [shape: f32[1,128], index: 10, kind: input, shape index: {}]   ;;  %s777_s11 = inlined_call_operand.vmem [shape: f32[128,4], index: 11, kind: input, shape index: {}]   ;;  %s778_s12 = inlined_call_operand.vmem [shape: f32[1,4], index: 12, kind: input, shape index: {}]   ;;  %s779_s13 = inlined_call_operand.vmem [shape: f32[16,4], index: 13, kind: output, shape index: {}]  }
   0x1   :  { %19 = vsyncpa [#allocation5], 0 }
   0x2   :  { %20 = vsyncpa [#allocation8], 0  ;;  %s38_s27 = sshll.u32 %s767_s1, 4  ;;  %s554_s28 = smov [#allocation4]   ;;  %s39_s27 = int_to_ptr.hbm [resolvable:$true] %s38_s27 }
   0x3   :  { %s40_s29 = sshll.u32 %s554_s28, 4  ;;  %s72_s15 = sshll.u32 %s773_s7, 4  ;;  %s41_s29 = int_to_ptr.vmem [resolvable:$true] %s40_s29  ;;  %s73_s15 = int_to_ptr.hbm [resolvable:$true] %s72_s15 }
   0x4   :  { %s555_s16 = smov 128   ;;  %s556_s17 = smov 8  }
   0x5   :  { %46 = dma.hbm_to_vmem [thread:$0]  %s39_s27, 512, %s41_s29, [#allocation5], %s555_s16, %s555_s16, %s556_s17  }
   0x6   :  { %s557_s18 = smov [#allocation7]   ;;  %s25_s22 = sshll.u32 %s766_s0, 4  ;;  %s26_s22 = int_to_ptr.hbm [resolvable:$true] %s25_s22 }
   0x7   :  { %s74_s19 = sshll.u32 %s557_s18, 4  ;;  %s57_s24 = sshll.u32 %s771_s5, 4  ;;  %s75_s19 = int_to_ptr.vmem [resolvable:$true] %s74_s19  ;;  %s58_s24 = int_to_ptr.hbm [resolvable:$true] %s57_s24 }
   0x8   :  { %80 = dma.hbm_to_vmem [thread:$0]  %s73_s15, 2048, %s75_s19, [#allocation8], %s555_s16, %s555_s16, %s556_s17  }
   0x9   :  { %s558_s25 = smov [#allocation2]   ;;  %s559_s7 = smov [#allocation6]  }
   0xa   :  { %s27_s26 = sshll.u32 %s558_s25, 4  ;;  %s59_s27 = sshll.u32 %s559_s7, 4  ;;  %s28_s26 = int_to_ptr.vmem [resolvable:$true] %s27_s26  ;;  %s60_s27 = int_to_ptr.vmem [resolvable:$true] %s59_s27 }
   0xb   :  { %33 = dma.hbm_to_vmem [thread:$0]  %s26_s22, 256, %s28_s26, [#allocation3], %s555_s16, %s555_s16, %s556_s17  }
   0xc   :  { %s87_s30 = sshll.u32 %s775_s9, 4  ;;  %s560_s0 = smov [#allocation9]   ;;  %s88_s30 = int_to_ptr.hbm [resolvable:$true] %s87_s30 }
   0xd   :  { %65 = dma.hbm_to_vmem [thread:$0]  %s58_s24, 2048, %s60_s27, [#allocation5], %s555_s16, %s555_s16, %s556_s17  }
   0xe   :  { %s89_s14 = sshll.u32 %s560_s0, 4  ;;  %s90_s14 = int_to_ptr.vmem [resolvable:$true] %s89_s14 }
   0xf   :  { %95 = dma.hbm_to_vmem [thread:$0]  %s88_s30, 2048, %s90_s14, [#allocation8], %s555_s16, %s555_s16, %s556_s17  }
  0x10   :  { %548 = dma.done.wait [#allocation3], 256  }
  0x11   :  { %549 = vsyncadd [#allocation3], 4294967040 }
  0x12   :  { %550 = dma.done.wait [#allocation5], 2560  }
  0x13   :  { %551 = vsyncadd [#allocation5], 4294964736 }
  0x14   :  { %552 = dma.done.wait [#allocation8], 4096  }
  0x15   :  { %553 = vsyncadd [#allocation8], 4294963200  ;;  %v127_v0 = vld [vmem:[#allocation4 + $0x18] sm:$0xff]  ;;  %v126_v1 = vld [vmem:[#allocation4 + $0x10] sm:$0xff]  ;;  %vm132_vm0 = vcmask 261120   ;;  %vm387_vm1 = vcmask 31744  }
  0x16   :  { %151 = vmatpush.msra.mxu0 %v127_v0  ;;  %v125_v2 = vld [vmem:[#allocation4 + $0x8] sm:$0xff]  ;;  %v178_v4 = vld [vmem:[%s769_s3 + $0x70] sm:$0xff]  ;;  %v177_v6 = vld [vmem:[%s769_s3 + $0x68] sm:$0xff] }
  0x17   :  { %v179_v3 = vld [vmem:[%s769_s3 + $0x78] sm:$0xff]  ;;  %v124_v5 = vld [vmem:[#allocation4] sm:$0xff]  ;;  %v122_v7 = vld [vmem:[#allocation2] sm:$0xff] }
  0x18   :  { %152 = vmatpush.msra.mxu0 %v126_v1  ;;  %184 = vmatpush.msra.mxu1 %v179_v3  ;;  %v176_v8 = vld [vmem:[%s769_s3 + $0x60] sm:$0xff]  ;;  %v175_v9 = vld [vmem:[%s769_s3 + $0x58] sm:$0xff]  ;;  %v174_v10 = vld [vmem:[%s769_s3 + $0x50] sm:$0xff] }
  0x19   :  { %v173_v11 = vld [vmem:[%s769_s3 + $0x48] sm:$0xff]  ;;  %v172_v13 = vld [vmem:[%s769_s3 + $0x40] sm:$0xff]  ;;  %v171_v14 = vld [vmem:[%s769_s3 + $0x38] sm:$0xff] }
  0x1a   :  { %153 = vmatpush.msra.mxu0 %v125_v2  ;;  %185 = vmatpush.msra.mxu1 %v178_v4  ;;  %v123_v12 = vld [vmem:[#allocation2 + $0x8] sm:$0xff]  ;;  %v170_v15 = vld [vmem:[%s769_s3 + $0x30] sm:$0xff]  ;;  %v168_v17 = vld [vmem:[%s769_s3 + $0x20] sm:$0xff] }
  0x1b   :  { %v169_v16 = vld [vmem:[%s769_s3 + $0x28] sm:$0xff]  ;;  %v167_v18 = vld [vmem:[%s769_s3 + $0x18] sm:$0xff]  ;;  %v166_v19 = vld [vmem:[%s769_s3 + $0x10] sm:$0xff] }
  0x1c   :  { %154 = vmatpush.msra.mxu0 %v124_v5  ;;  %186 = vmatpush.msra.mxu1 %v177_v6  ;;  %v165_v20 = vld [vmem:[%s769_s3 + $0x8] sm:$0xff]  ;;  %v164_v21 = vld [vmem:[%s769_s3] sm:$0xff]  ;;  %v222_v24 = vld [vmem:[#allocation6 + $0x68] sm:$0xff] }
  0x1d   :  { %397 = vmatmul.msk.f32.vlgmr.msra.gmra.mxu0 %vm132_vm0, %v122_v7  ;;  %v224_v22 = vld [vmem:[#allocation6 + $0x78] sm:$0xff]  ;;  %v223_v23 = vld [vmem:[#allocation6 + $0x70] sm:$0xff]  ;;  %v221_v25 = vld [vmem:[#allocation6 + $0x60] sm:$0xff] }
  0x1e   :  { %187 = vmatpush.msra.mxu1 %v176_v8  ;;  %229 = vmatpush.msra.mxu2 %v224_v22  ;;  %v220_v26 = vld [vmem:[#allocation6 + $0x58] sm:$0xff]  ;;  %v219_v27 = vld [vmem:[#allocation6 + $0x50] sm:$0xff]  ;;  %v218_v28 = vld [vmem:[#allocation6 + $0x48] sm:$0xff] }
  0x1f   :  { %v217_v29 = vld [vmem:[#allocation6 + $0x40] sm:$0xff]  ;;  %v216_v30 = vld [vmem:[#allocation6 + $0x38] sm:$0xff]  ;;  %v422_v31 = vld [vmem:[%s768_s2] ss:$0 sm:$0xff] }
  0x20   :  { %188 = vmatpush.msra.mxu1 %v175_v9  ;;  %230 = vmatpush.msra.mxu2 %v223_v23  ;;  %v215_v32 = vld [vmem:[#allocation6 + $0x30] sm:$0xff]  ;;  %v214_v33 = vld [vmem:[#allocation6 + $0x28] sm:$0xff]  ;;  %v213_v36 = vld [vmem:[#allocation6 + $0x20] sm:$0xff] }
  0x21   :  { %v212_v38 = vld [vmem:[#allocation6 + $0x18] sm:$0xff]  ;;  %v211_v42 = vld [vmem:[#allocation6 + $0x10] sm:$0xff]  ;;  %v210_v43 = vld [vmem:[#allocation6 + $0x8] sm:$0xff] }
  0x22   :  { %189 = vmatpush.msra.mxu1 %v174_v10  ;;  %231 = vmatpush.msra.mxu2 %v222_v24  ;;  %v209_v44 = vld [vmem:[#allocation6] sm:$0xff]  ;;  %v269_v45 = vld [vmem:[#allocation7 + $0x78] sm:$0xff]  ;;  %v268_v46 = vld [vmem:[#allocation7 + $0x70] sm:$0xff] }
  0x23   :  { %274 = vmatpush.msra.mxu3 %v269_v45  ;;  %v267_v47 = vld [vmem:[#allocation7 + $0x68] sm:$0xff]  ;;  %v266_v48 = vld [vmem:[#allocation7 + $0x60] sm:$0xff]  ;;  %v265_v49 = vld [vmem:[#allocation7 + $0x58] sm:$0xff] }
  0x24   :  { %190 = vmatpush.msra.mxu1 %v173_v11  ;;  %232 = vmatpush.msra.mxu2 %v221_v25  ;;  %v264_v50 = vld [vmem:[#allocation7 + $0x50] sm:$0xff]  ;;  %v263_v51 = vld [vmem:[#allocation7 + $0x48] sm:$0xff]  ;;  %v262_v52 = vld [vmem:[#allocation7 + $0x40] sm:$0xff] }
  0x25   :  { %398 = vmatmul.msk.f32.gmra.mxu0 %vm132_vm0, %v123_v12  ;;  %275 = vmatpush.msra.mxu3 %v268_v46  ;;  %v261_v53 = vld [vmem:[#allocation7 + $0x38] sm:$0xff]  ;;  %v423_v54 = vld [vmem:[%s770_s4] ss:$0 sm:$0xff]  ;;  %v259_v56 = vld [vmem:[#allocation7 + $0x28] sm:$0xff] }
  0x26   :  { %191 = vmatpush.msra.mxu1 %v172_v13  ;;  %233 = vmatpush.msra.mxu2 %v220_v26  ;;  %v260_v55 = vld [vmem:[#allocation7 + $0x30] sm:$0xff]  ;;  %v258_v59 = vld [vmem:[#allocation7 + $0x20] sm:$0xff]  ;;  %v257_v61 = vld [vmem:[#allocation7 + $0x18] sm:$0xff] }
  0x27   :  { %276 = vmatpush.msra.mxu3 %v267_v47  ;;  %v256_v1 = vld [vmem:[#allocation7 + $0x10] sm:$0xff]  ;;  %v255_v2 = vld [vmem:[#allocation7 + $0x8] sm:$0xff]  ;;  %v254_v3 = vld [vmem:[#allocation7] sm:$0xff] }
  0x28   :  { %192 = vmatpush.msra.mxu1 %v171_v14  ;;  %234 = vmatpush.msra.mxu2 %v219_v27  ;;  %v314_v4 = vld [vmem:[#allocation9 + $0x78] sm:$0xff]  ;;  %v313_v5 = vld [vmem:[#allocation9 + $0x70] sm:$0xff]  ;;  %v312_v6 = vld [vmem:[#allocation9 + $0x68] sm:$0xff] }
  0x29   :  { %277 = vmatpush.msra.mxu3 %v266_v48  ;;  %319 = vmatpush.msrb.mxu0 %v314_v4  ;;  %v311_v7 = vld [vmem:[#allocation9 + $0x60] sm:$0xff]  ;;  %v310_v8 = vld [vmem:[#allocation9 + $0x58] sm:$0xff]  ;;  %v309_v9 = vld [vmem:[#allocation9 + $0x50] sm:$0xff] }
  0x2a   :  { %193 = vmatpush.msra.mxu1 %v170_v15  ;;  %235 = vmatpush.msra.mxu2 %v218_v28  ;;  %v308_v10 = vld [vmem:[#allocation9 + $0x48] sm:$0xff]  ;;  %v307_v11 = vld [vmem:[#allocation9 + $0x40] sm:$0xff]  ;;  %v306_v12 = vld [vmem:[#allocation9 + $0x38] sm:$0xff] }
  0x2b   :  { %278 = vmatpush.msra.mxu3 %v265_v49  ;;  %320 = vmatpush.msrb.mxu0 %v313_v5  ;;  %v424_v13 = vld [vmem:[%s772_s6] ss:$0 sm:$0xff]  ;;  %v304_v15 = vld [vmem:[#allocation9 + $0x28] sm:$0xff]  ;;  %v299_v26 = vld [vmem:[#allocation9] sm:$0xff] }
  0x2c   :  { %194 = vmatpush.msra.mxu1 %v169_v16  ;;  %236 = vmatpush.msra.mxu2 %v217_v29  ;;  %v305_v14 = vld [vmem:[#allocation9 + $0x30] sm:$0xff]  ;;  %v300_v25 = vld [vmem:[#allocation9 + $0x8] sm:$0xff]  ;;  %v358_v28 = vld [vmem:[%s777_s11 + $0x70] sm:$0xff] }
  0x2d   :  { %279 = vmatpush.msra.mxu3 %v264_v50  ;;  %321 = vmatpush.msrb.mxu0 %v312_v6  ;;  %v301_v24 = vld [vmem:[#allocation9 + $0x10] sm:$0xff]  ;;  %v359_v27 = vld [vmem:[%s777_s11 + $0x78] sm:$0xff]  ;;  %v357_v29 = vld [vmem:[%s777_s11 + $0x68] sm:$0xff] }
  0x2e   :  { %195 = vmatpush.msra.mxu1 %v168_v17  ;;  %237 = vmatpush.msra.mxu2 %v216_v30  ;;  %v356_v30 = vld [vmem:[%s777_s11 + $0x60] sm:$0xff]  ;;  %v346_v47 = vld [vmem:[%s777_s11 + $0x10] sm:$0xff]  ;;  %v345_v48 = vld [vmem:[%s777_s11 + $0x8] sm:$0xff] }
  0x2f   :  { %280 = vmatpush.msra.mxu3 %v263_v51  ;;  %322 = vmatpush.msrb.mxu0 %v311_v7  ;;  %v344_v49 = vld [vmem:[%s777_s11] sm:$0xff] }
  0x30   :  { %196 = vmatpush.msra.mxu1 %v167_v18  ;;  %238 = vmatpush.msra.mxu2 %v215_v32  ;;  %v303_v18 = vld [vmem:[#allocation9 + $0x20] sm:$0xff]  ;;  %v426_v50 = vld [vmem:[%s776_s10] ss:$0 sm:$0xff] }
  0x31   :  { %281 = vmatpush.msra.mxu3 %v262_v52  ;;  %323 = vmatpush.msrb.mxu0 %v310_v8  ;;  %v354_v32 = vld [vmem:[%s777_s11 + $0x50] sm:$0xff] }
  0x32   :  { %197 = vmatpush.msra.mxu1 %v166_v19  ;;  %239 = vmatpush.msra.mxu2 %v214_v33  ;;  %v353_v33 = vld [vmem:[%s777_s11 + $0x48] sm:$0xff] }
  0x33   :  { %282 = vmatpush.msra.mxu3 %v261_v53  ;;  %324 = vmatpush.msrb.mxu0 %v309_v9 }
  0x34   :  { %198 = vmatpush.msra.mxu1 %v165_v20  ;;  %240 = vmatpush.msra.mxu2 %v213_v36  ;;  %v302_v20 = vld [vmem:[#allocation9 + $0x18] sm:$0xff]  ;;  %v425_v36 = vld [vmem:[%s774_s8] ss:$0 sm:$0xff] }
  0x35   :  { %283 = vmatpush.msra.mxu3 %v260_v55  ;;  %325 = vmatpush.msrb.mxu0 %v308_v10 }
  0x36   :  { %199 = vmatpush.msra.mxu1 %v164_v21  ;;  %241 = vmatpush.msra.mxu2 %v212_v38  ;;  %v349_v38 = vld [vmem:[%s777_s11 + $0x28] sm:$0xff] }
  0x37   :  { %284 = vmatpush.msra.mxu3 %v259_v56  ;;  %326 = vmatpush.msrb.mxu0 %v307_v11 }
  0x38   :  { %242 = vmatpush.msra.mxu2 %v211_v42  ;;  %364 = vmatpush.msrb.mxu1 %v359_v27 }
  0x39   :  { %285 = vmatpush.msra.mxu3 %v258_v59  ;;  %327 = vmatpush.msrb.mxu0 %v306_v12 }
  0x3a   :  { %243 = vmatpush.msra.mxu2 %v210_v43  ;;  %365 = vmatpush.msrb.mxu1 %v358_v28  ;;  %v347_v43 = vld [vmem:[%s777_s11 + $0x18] sm:$0xff] }
  0x3b   :  { %286 = vmatpush.msra.mxu3 %v257_v61  ;;  %328 = vmatpush.msrb.mxu0 %v305_v14 }
  0x3c   :  { %244 = vmatpush.msra.mxu2 %v209_v44  ;;  %366 = vmatpush.msrb.mxu1 %v357_v29 }
  0x3d   :  { %287 = vmatpush.msra.mxu3 %v256_v1  ;;  %329 = vmatpush.msrb.mxu0 %v304_v15 }
  0x3e   :  { %399 = vmatpush.msrb.mxu2 %v359_v27  ;;  %367 = vmatpush.msrb.mxu1 %v356_v30 }
  0x3f   :  { %288 = vmatpush.msra.mxu3 %v255_v2  ;;  %330 = vmatpush.msrb.mxu0 %v303_v18 }
  0x40   :  { %400 = vmatpush.msrb.mxu2 %v358_v28 }
  0x41   :  { %289 = vmatpush.msra.mxu3 %v254_v3  ;;  %331 = vmatpush.msrb.mxu0 %v302_v20 }
  0x42   :  { %401 = vmatpush.msrb.mxu2 %v357_v29 }
  0x43   :  { %332 = vmatpush.msrb.mxu0 %v301_v24 }
  0x44   :  { %402 = vmatpush.msrb.mxu2 %v356_v30 }
  0x45   :  { %333 = vmatpush.msrb.mxu0 %v300_v25 }
  0x47   :  { %334 = vmatpush.msrb.mxu0 %v299_v26 }
  0x9a   :  { %v156_v34 = vpop.f32.mrf.mxu0 }
  0x9b   :  { %v157_v35 = vadd.f32 %v422_v31, %v156_v34  ;;  %v352_v34 = vld [vmem:[%s777_s11 + $0x40] sm:$0xff] }
  0x9d   :  { %v162_v37 = vmax.f32 %v157_v35, 0.0  ;;  %v351_v35 = vld [vmem:[%s777_s11 + $0x38] sm:$0xff] }
  0x9f   :  { %200 = vmatmul.f32.vlgmr.msra.gmra.mxu1 %v162_v37  ;;  %v350_v37 = vld [vmem:[%s777_s11 + $0x30] sm:$0xff] }
  0xa2   :  { %v159_v39 = vpop.f32.mrf.mxu0 }
  0xa3   :  { %v160_v40 = vadd.f32 %v422_v31, %v159_v39  ;;  %v355_v31 = vld [vmem:[%s777_s11 + $0x58] sm:$0xff] }
  0xa4   :  { %368 = vmatpush.msrb.mxu1 %v355_v31  ;;  %403 = vmatpush.msrb.mxu2 %v355_v31 }
  0xa5   :  { %v163_v41 = vmax.f32 %v160_v40, 0.0 }
  0xa6   :  { %369 = vmatpush.msrb.mxu1 %v354_v32  ;;  %404 = vmatpush.msrb.mxu2 %v354_v32 }
  0xa7   :  { %203 = vmatmul.f32.gmra.mxu1 %v163_v41  ;;  %v348_v41 = vld [vmem:[%s777_s11 + $0x20] sm:$0xff] }
  0xa8   :  { %370 = vmatpush.msrb.mxu1 %v353_v33  ;;  %405 = vmatpush.msrb.mxu2 %v353_v33 }
  0xaa   :  { %371 = vmatpush.msrb.mxu1 %v352_v34  ;;  %406 = vmatpush.msrb.mxu2 %v352_v34 }
  0xac   :  { %372 = vmatpush.msrb.mxu1 %v351_v35  ;;  %407 = vmatpush.msrb.mxu2 %v351_v35 }
  0xae   :  { %373 = vmatpush.msrb.mxu1 %v350_v37  ;;  %408 = vmatpush.msrb.mxu2 %v350_v37 }
  0xb0   :  { %374 = vmatpush.msrb.mxu1 %v349_v38  ;;  %409 = vmatpush.msrb.mxu2 %v349_v38 }
  0xb2   :  { %375 = vmatpush.msrb.mxu1 %v348_v41  ;;  %410 = vmatpush.msrb.mxu2 %v348_v41 }
  0xb4   :  { %376 = vmatpush.msrb.mxu1 %v347_v43  ;;  %411 = vmatpush.msrb.mxu2 %v347_v43 }
  0xb6   :  { %377 = vmatpush.msrb.mxu1 %v346_v47  ;;  %412 = vmatpush.msrb.mxu2 %v346_v47 }
  0xb8   :  { %378 = vmatpush.msrb.mxu1 %v345_v48  ;;  %413 = vmatpush.msrb.mxu2 %v345_v48 }
  0xba   :  { %379 = vmatpush.msrb.mxu1 %v344_v49  ;;  %414 = vmatpush.msrb.mxu2 %v344_v49 }
 0x11c   :  { %v201_v57 = vpop.f32.mrf.mxu1 }
 0x11d   :  { %v202_v58 = vadd.f32 %v423_v54, %v201_v57  ;;  %v427_v57 = vld [vmem:[%s778_s12] ss:$0 sm:$0xff] }
 0x11f   :  { %v207_v60 = vmax.f32 %v202_v58, 0.0 }
 0x121   :  { %245 = vmatmul.f32.vlgmr.msra.gmra.mxu2 %v207_v60 }
 0x124   :  { %v204_v62 = vpop.f32.mrf.mxu1 }
 0x125   :  { %v205_v63 = vadd.f32 %v423_v54, %v204_v62 }
 0x127   :  { %v208_v0 = vmax.f32 %v205_v63, 0.0 }
 0x129   :  { %248 = vmatmul.f32.gmra.mxu2 %v208_v0 }
 0x1a4   :  { %v246_v16 = vpop.f32.mrf.mxu2 }
 0x1a5   :  { %v247_v17 = vadd.f32 %v424_v13, %v246_v16 }
 0x1a7   :  { %v252_v19 = vmax.f32 %v247_v17, 0.0 }
 0x1a9   :  { %290 = vmatmul.f32.vlgmr.msra.gmra.mxu3 %v252_v19 }
 0x1ac   :  { %v249_v21 = vpop.f32.mrf.mxu2 }
 0x1ad   :  { %v250_v22 = vadd.f32 %v424_v13, %v249_v21 }
 0x1af   :  { %v253_v23 = vmax.f32 %v250_v22, 0.0 }
 0x1b1   :  { %293 = vmatmul.f32.gmra.mxu3 %v253_v23 }
 0x22c   :  { %v291_v39 = vpop.f32.mrf.mxu3 }
 0x22d   :  { %v292_v40 = vadd.f32 %v425_v36, %v291_v39 }
 0x22f   :  { %v297_v42 = vmax.f32 %v292_v40, 0.0 }
 0x231   :  { %335 = vmatmul.f32.vlgmr.msrb.gmra.mxu0 %v297_v42 }
 0x234   :  { %v294_v44 = vpop.f32.mrf.mxu3 }
 0x235   :  { %v295_v45 = vadd.f32 %v425_v36, %v294_v44 }
 0x237   :  { %v298_v46 = vmax.f32 %v295_v45, 0.0 }
 0x239   :  { %338 = vmatmul.f32.gmra.mxu0 %v298_v46 }
 0x2ae   :  { %v336_v51 = vpop.f32.mrf.mxu0 }
 0x2af   :  { %v337_v52 = vadd.f32 %v426_v50, %v336_v51 }
 0x2b1   :  { %v342_v53 = vmax.f32 %v337_v52, 0.0 }
 0x2b3   :  { %380 = vmatmul.f32.vlgmr.msrb.gmra.mxu1 %v342_v53 }
 0x2b6   :  { %v339_v54 = vpop.f32.mrf.mxu0 }
 0x2b7   :  { %v340_v55 = vadd.f32 %v426_v50, %v339_v54 }
 0x2b9   :  { %v343_v56 = vmax.f32 %v340_v55, 0.0 }
 0x2bb   :  { %383 = vmatmul.f32.vlgmr.msrb.gmra.mxu2 %v343_v56 }
 0x330   :  { %v381_v58 = vpop.f32.mrf.mxu1 }
 0x331   :  { %v382_v59 = vadd.f32 %v427_v57, %v381_v58 }
 0x333   :  { %388 = vst.msk [vmem:[%s779_s13] sm:$0xff] %vm387_vm1, %v382_v59 }
 0x33e   :  { %v384_v60 = vpop.f32.mrf.mxu2 }
 0x33f   :  { %v385_v61 = vadd.f32 %v427_v57, %v384_v60 }
 0x341   :  { %389 = vst.msk [vmem:[%s779_s13 + $0x8] sm:$0xff] %vm387_vm1, %v385_v61 }
 0x342   :  { %394 = vsyncpa [#allocation3], 1 }
 0x343   :  { %395 = vsyncpa [#allocation5], 1 }
 0x344   :  { %396 = vsyncpa [#allocation8], 1 }

</bundles_post_ra>
